<compile_context>
chip_gen: v5e
topology: v5e:2x2
jax: 0.10.0
libtpu: 0.0.40
codegen_flags: <defaults>
</compile_context>

<pallas_src>
import jax
import jax.numpy as jnp
from jax.experimental import pallas as pl
from jax.experimental.pallas import tpu as pltpu

EPS = 1e-5  # nn.BatchNorm2d default eps


def _banded_weights(w_hwio, width):
    """(3,3,Cin,Cout) HWIO kernel -> (3, width*Cin, width*Cout) block-banded matrices.

    wb[dy, wi*Cin+ci, wo*Cout+co] = w_hwio[dy, wi-wo+1, ci, co] when |wi-wo| <= 1, else 0.
    Multiplying a row-slab (rows, width*Cin) by wb[dy] performs the full dx sweep of a
    3x3 "same" conv for kernel row dy, including the W-edge zero padding.
    """
    kh, kw, cin, cout = w_hwio.shape
    wi = jnp.arange(width)[:, None]
    wo = jnp.arange(width)[None, :]
    dx = wi - wo + 1
    valid = (dx >= 0) & (dx < kw)
    dx_c = jnp.clip(dx, 0, kw - 1)
    blocks = jnp.transpose(w_hwio, (1, 0, 2, 3))[dx_c]            # (W, W, kh, cin, cout)
    blocks = jnp.where(valid[:, :, None, None, None], blocks, 0.0)
    return jnp.transpose(blocks, (2, 0, 3, 1, 4)).reshape(kh, width * cin, width * cout)


def double_conv(x_nchw, w1, g1, b1, w2, g2, b2):
    """x_nchw: (N, Cin, H, W); w*: (3, 3, Cin/out, Cout) HWIO; returns NCHW f32."""
    x = jnp.transpose(x_nchw, (0, 2, 3, 1)).astype(jnp.float32)   # -> NHWC
    N, H, W, Cin = x.shape
    Cout = w1.shape[-1]
    Hp = H + 2
    WCin, WCout = W * Cin, W * Cout
    M = N * H
    inv_cnt = 1.0 / float(N * H * W)

    # H-only zero padding (W edges handled by the banded weights); bf16 MXU input.
    # Pre-stack the three H-shifted slabs so conv1 reads are sublane-aligned static indices.
    x_pad = jnp.pad(x, ((0, 0), (1, 1), (0, 0), (0, 0)))
    x_rs = x_pad.reshape(N, Hp, WCin).astype(jnp.bfloat16)
    x_sh = jnp.stack([x_rs[:, dy:dy + H, :] for dy in range(3)], axis=0)   # (3, N, H, WCin)

    w1b = _banded_weights(w1.astype(jnp.float32), W).astype(jnp.bfloat16)  # (3, WCin, WCout)
    w2b = _banded_weights(w2.astype(jnp.float32), W).astype(jnp.bfloat16)  # (3, WCout, WCout)

    # BN affine params pre-tiled to the lane layout (lane j = w*Cout + c).
    g1t = jnp.tile(g1.astype(jnp.float32), W).reshape(1, WCout)
    b1t = jnp.tile(b1.astype(jnp.float32), W).reshape(1, WCout)
    g2t = jnp.tile(g2.astype(jnp.float32), W).reshape(1, WCout)
    b2t = jnp.tile(b2.astype(jnp.float32), W).reshape(1, WCout)

    # 0/1 matrix (scaled by 1/(N*H*W)): sums lanes belonging to the same channel and
    # broadcasts the per-channel mean straight back to every lane of that channel.
    lane = jnp.arange(WCout)
    agg = (lane[:, None] % Cout == lane[None, :] % Cout).astype(jnp.float32) * inv_cnt

    def kernel(x_ref, w1_ref, w2_ref, g1_ref, b1_ref, g2_ref, b2_ref, agg_ref,
               o_ref, hpad_ref):
        # x_ref   : (3, N, H, W*Cin) bf16, pre-shifted conv1 slabs, W folded into lanes
        # w*_ref  : (3, K, W*Cout)   bf16 banded weights (K = W*Cin / W*Cout)
        # g*/b*   : (1, W*Cout)      f32, pre-tiled gamma/beta
        # agg_ref : (W*Cout, W*Cout) f32 channel-aggregation matrix (pre-scaled by 1/count)
        # o_ref   : (N*H, W*Cout)    f32, lane-dense output
        # hpad_ref: (N, Hp, W*Cout)  bf16 scratch for the H-padded intermediate

        def conv3(get_slab, w_ref, k):
            acc = None
            for dy in range(3):                                   # 3 full-K MXU matmuls
                rows = get_slab(dy).reshape(M, k)
                term = jnp.dot(rows, w_ref[dy], preferred_element_type=jnp.float32)
                acc = term if acc is None else acc + term
            return acc                                            # (M, W*Cout) f32

        def bn_relu(acc, g_ref, b_ref):
            # Single-pass stats: per-lane sum / sum-of-squares, then one tiny matmul to
            # aggregate per channel and broadcast the mean back to every lane.
            s1 = jnp.sum(acc, axis=0, keepdims=True)              # (1, W*Cout)
            s2 = jnp.sum(acc * acc, axis=0, keepdims=True)
            mean = jnp.dot(s1, agg_ref[...], preferred_element_type=jnp.float32)
            ex2 = jnp.dot(s2, agg_ref[...], preferred_element_type=jnp.float32)
            var = ex2 - mean * mean                               # biased (training-mode BN)
            scale = g_ref[...] * jax.lax.rsqrt(var + EPS)         # rsqrt -> EUP slot
            shift = b_ref[...] - mean * scale
            return jnp.maximum(acc * scale + shift, 0.0)

        # Conv1 -> BN -> ReLU  (aligned, pre-shifted input slabs)
        y1 = bn_relu(conv3(lambda dy: x_ref[dy], w1_ref, WCin), g1_ref, b1_ref)

        # H-padded intermediate: zero only the two halo rows; write the interior once (bf16).
        zero_row = jnp.zeros((N, 1, WCout), hpad_ref.dtype)
        hpad_ref[:, 0:1, :] = zero_row
        hpad_ref[:, Hp - 1:Hp, :] = zero_row
        hpad_ref[:, 1:H + 1, :] = y1.reshape(N, H, WCout).astype(hpad_ref.dtype)

        # Conv2 -> BN -> ReLU, lane-dense store.
        y2 = bn_relu(conv3(lambda dy: hpad_ref[:, dy:dy + H, :], w2_ref, WCout),
                     g2_ref, b2_ref)
        o_ref[...] = y2.astype(o_ref.dtype)

    # TODO(synk): for UNet-scale shapes add a grid over N / H row-strips (marked "parallel"
    # so v7x's two TensorCores are used) with a two-pass BN (accumulate per-channel
    # sum/sumsq across tiles, then normalize), and tile W so the banded weights stay small.
    out2d = pl.pallas_call(
        kernel,
        out_shape=jax.ShapeDtypeStruct((M, WCout), jnp.float32),
        in_specs=[pl.BlockSpec(memory_space=pltpu.MemorySpace.VMEM)] * 8,
        out_specs=pl.BlockSpec(memory_space=pltpu.MemorySpace.VMEM),
        scratch_shapes=[pltpu.VMEM((N, Hp, WCout), jnp.bfloat16)],
    )(x_sh, w1b, w2b, g1t, b1t, g2t, b2t, agg)

    return jnp.transpose(out2d.reshape(N, H, W, Cout), (0, 3, 1, 2))   # -> NCHW


def _bn_relu_ref(y, g, b):
    mean = jnp.mean(y, axis=(0, 1, 2), keepdims=True)
    var = jnp.mean((y - mean) ** 2, axis=(0, 1, 2), keepdims=True)
    return jnp.maximum((y - mean) * jax.lax.rsqrt(var + EPS) * g + b, 0.0)


def _ref_double_conv(x_nchw, w1, g1, b1, w2, g2, b2):
    # Matches the kernel's precision plan: bf16 conv inputs, f32 accumulation and f32 BN.
    x = jnp.transpose(x_nchw, (0, 2, 3, 1)).astype(jnp.float32)
    dn = ("NHWC", "HWIO", "NHWC")
    y = jax.lax.conv_general_dilated(x.astype(jnp.bfloat16), w1.astype(jnp.bfloat16),
                                     (1, 1), "SAME", dimension_numbers=dn,
                                     preferred_element_type=jnp.float32)
    y = _bn_relu_ref(y, g1, b1)
    y = jax.lax.conv_general_dilated(y.astype(jnp.bfloat16), w2.astype(jnp.bfloat16),
                                     (1, 1), "SAME", dimension_numbers=dn,
                                     preferred_element_type=jnp.float32)
    y = _bn_relu_ref(y, g2, b2)
    return jnp.transpose(y, (0, 3, 1, 2))


if __name__ == "__main__":
    key = jax.random.PRNGKey(0)
    k_x, k_w1, k_w2 = jax.random.split(key, 3)

    N, Cin, Cout, H, W = 2, 4, 8, 16, 16
    x = jax.random.normal(k_x, (N, Cin, H, W), dtype=jnp.float32)

    # Deterministic synthetic params (Conv2d has no bias; BN init: gamma=1, beta=0).
    w1 = jax.random.normal(k_w1, (3, 3, Cin, Cout), dtype=jnp.float32) * 0.1
    w2 = jax.random.normal(k_w2, (3, 3, Cout, Cout), dtype=jnp.float32) * 0.1
    g1 = jnp.ones((Cout,), jnp.float32)
    b1 = jnp.zeros((Cout,), jnp.float32)
    g2 = jnp.ones((Cout,), jnp.float32)
    b2 = jnp.zeros((Cout,), jnp.float32)

    out = double_conv(x, w1, g1, b1, w2, g2, b2)
    out = jax.block_until_ready(out)

    ref = jax.block_until_ready(_ref_double_conv(x, w1, g1, b1, w2, g2, b2))
    assert out.shape == (N, Cout, H, W), out.shape
    assert jnp.allclose(out, ref, atol=1e-2, rtol=1e-2), float(jnp.max(jnp.abs(out - ref)))

    print("KERNEL_OK")
</pallas_src>

<mosaic_0001>
module attributes {stable_mosaic.version = 11 : i64} {
  func.func @kernel(%arg0: memref<3x2x16x64xbf16, #tpu.memory_space<vmem>>, %arg1: memref<3x64x128xbf16, #tpu.memory_space<vmem>>, %arg2: memref<3x128x128xbf16, #tpu.memory_space<vmem>>, %arg3: memref<1x128xf32, #tpu.memory_space<vmem>>, %arg4: memref<1x128xf32, #tpu.memory_space<vmem>>, %arg5: memref<1x128xf32, #tpu.memory_space<vmem>>, %arg6: memref<1x128xf32, #tpu.memory_space<vmem>>, %arg7: memref<128x128xf32, #tpu.memory_space<vmem>>, %arg8: memref<32x128xf32, #tpu.memory_space<vmem>>, %arg9: memref<2x18x128xbf16, #tpu.memory_space<vmem>>) attributes {dimension_semantics = [], scalar_prefetch = 0 : i64, scratch_operands = 1 : i64, tpu.core_type = #tpu.core_type<tc>} {
    %c0 = arith.constant 0 : index
    %c0_0 = arith.constant 0 : index
    %c0_1 = arith.constant 0 : index
    %c0_2 = arith.constant 0 : index
    %0 = vector.load %arg0[%c0, %c0_0, %c0_1, %c0_2] : memref<3x2x16x64xbf16, #tpu.memory_space<vmem>>, vector<1x2x16x64xbf16>
    %1 = vector.shape_cast %0 : vector<1x2x16x64xbf16> to vector<2x16x64xbf16>
    %2 = vector.shape_cast %1 : vector<2x16x64xbf16> to vector<32x64xbf16>
    %c0_3 = arith.constant 0 : index
    %c0_4 = arith.constant 0 : index
    %c0_5 = arith.constant 0 : index
    %3 = vector.load %arg1[%c0_3, %c0_4, %c0_5] : memref<3x64x128xbf16, #tpu.memory_space<vmem>>, vector<1x64x128xbf16>
    %4 = vector.shape_cast %3 : vector<1x64x128xbf16> to vector<64x128xbf16>
    %cst = arith.constant dense<0.000000e+00> : vector<32x128xf32>
    %5 = tpu.matmul %2, %4, %cst {dimension_numbers = #tpu.dot_dimension_numbers<[1], [0], [0], [1], [0, 0, 1, 1], [], []>} : vector<32x64xbf16>, vector<64x128xbf16>, vector<32x128xf32> -> vector<32x128xf32>
    %c1 = arith.constant 1 : index
    %c0_6 = arith.constant 0 : index
    %c0_7 = arith.constant 0 : index
    %c0_8 = arith.constant 0 : index
    %6 = vector.load %arg0[%c1, %c0_6, %c0_7, %c0_8] : memref<3x2x16x64xbf16, #tpu.memory_space<vmem>>, vector<1x2x16x64xbf16>
    %7 = vector.shape_cast %6 : vector<1x2x16x64xbf16> to vector<2x16x64xbf16>
    %8 = vector.shape_cast %7 : vector<2x16x64xbf16> to vector<32x64xbf16>
    %c1_9 = arith.constant 1 : index
    %c0_10 = arith.constant 0 : index
    %c0_11 = arith.constant 0 : index
    %9 = vector.load %arg1[%c1_9, %c0_10, %c0_11] : memref<3x64x128xbf16, #tpu.memory_space<vmem>>, vector<1x64x128xbf16>
    %10 = vector.shape_cast %9 : vector<1x64x128xbf16> to vector<64x128xbf16>
    %cst_12 = arith.constant dense<0.000000e+00> : vector<32x128xf32>
    %11 = tpu.matmul %8, %10, %cst_12 {dimension_numbers = #tpu.dot_dimension_numbers<[1], [0], [0], [1], [0, 0, 1, 1], [], []>} : vector<32x64xbf16>, vector<64x128xbf16>, vector<32x128xf32> -> vector<32x128xf32>
    %12 = arith.addf %5, %11 : vector<32x128xf32>
    %c2 = arith.constant 2 : index
    %c0_13 = arith.constant 0 : index
    %c0_14 = arith.constant 0 : index
    %c0_15 = arith.constant 0 : index
    %13 = vector.load %arg0[%c2, %c0_13, %c0_14, %c0_15] : memref<3x2x16x64xbf16, #tpu.memory_space<vmem>>, vector<1x2x16x64xbf16>
    %14 = vector.shape_cast %13 : vector<1x2x16x64xbf16> to vector<2x16x64xbf16>
    %15 = vector.shape_cast %14 : vector<2x16x64xbf16> to vector<32x64xbf16>
    %c2_16 = arith.constant 2 : index
    %c0_17 = arith.constant 0 : index
    %c0_18 = arith.constant 0 : index
    %16 = vector.load %arg1[%c2_16, %c0_17, %c0_18] : memref<3x64x128xbf16, #tpu.memory_space<vmem>>, vector<1x64x128xbf16>
    %17 = vector.shape_cast %16 : vector<1x64x128xbf16> to vector<64x128xbf16>
    %cst_19 = arith.constant dense<0.000000e+00> : vector<32x128xf32>
    %18 = tpu.matmul %15, %17, %cst_19 {dimension_numbers = #tpu.dot_dimension_numbers<[1], [0], [0], [1], [0, 0, 1, 1], [], []>} : vector<32x64xbf16>, vector<64x128xbf16>, vector<32x128xf32> -> vector<32x128xf32>
    %19 = arith.addf %12, %18 : vector<32x128xf32>
    %cst_20 = arith.constant dense<0.000000e+00> : vector<128xf32>
    %20 = vector.multi_reduction <add>, %19, %cst_20 [0] : vector<32x128xf32> to vector<128xf32>
    %21 = vector.shape_cast %20 : vector<128xf32> to vector<1x128xf32>
    %22 = arith.mulf %19, %19 : vector<32x128xf32>
    %cst_21 = arith.constant dense<0.000000e+00> : vector<128xf32>
    %23 = vector.multi_reduction <add>, %22, %cst_21 [0] : vector<32x128xf32> to vector<128xf32>
    %24 = vector.shape_cast %23 : vector<128xf32> to vector<1x128xf32>
    %c0_22 = arith.constant 0 : index
    %c0_23 = arith.constant 0 : index
    %25 = vector.load %arg7[%c0_22, %c0_23] : memref<128x128xf32, #tpu.memory_space<vmem>>, vector<128x128xf32>
    %cst_24 = arith.constant dense<0.000000e+00> : vector<1x128xf32>
    %26 = tpu.matmul %21, %25, %cst_24 {dimension_numbers = #tpu.dot_dimension_numbers<[1], [0], [0], [1], [0, 0, 1, 1], [], []>} : vector<1x128xf32>, vector<128x128xf32>, vector<1x128xf32> -> vector<1x128xf32>
    %c0_25 = arith.constant 0 : index
    %c0_26 = arith.constant 0 : index
    %27 = vector.load %arg7[%c0_25, %c0_26] : memref<128x128xf32, #tpu.memory_space<vmem>>, vector<128x128xf32>
    %cst_27 = arith.constant dense<0.000000e+00> : vector<1x128xf32>
    %28 = tpu.matmul %24, %27, %cst_27 {dimension_numbers = #tpu.dot_dimension_numbers<[1], [0], [0], [1], [0, 0, 1, 1], [], []>} : vector<1x128xf32>, vector<128x128xf32>, vector<1x128xf32> -> vector<1x128xf32>
    %29 = arith.mulf %26, %26 : vector<1x128xf32>
    %30 = arith.subf %28, %29 : vector<1x128xf32>
    %c0_28 = arith.constant 0 : index
    %c0_29 = arith.constant 0 : index
    %31 = vector.load %arg3[%c0_28, %c0_29] : memref<1x128xf32, #tpu.memory_space<vmem>>, vector<1x128xf32>
    %cst_30 = arith.constant 9.99999974E-6 : f32
    %32 = vector.broadcast %cst_30 : f32 to vector<1x128xf32>
    %33 = arith.addf %30, %32 : vector<1x128xf32>
    %34 = math.rsqrt %33 : vector<1x128xf32>
    %35 = arith.mulf %31, %34 : vector<1x128xf32>
    %c0_31 = arith.constant 0 : index
    %c0_32 = arith.constant 0 : index
    %36 = vector.load %arg4[%c0_31, %c0_32] : memref<1x128xf32, #tpu.memory_space<vmem>>, vector<1x128xf32>
    %37 = arith.mulf %26, %35 : vector<1x128xf32>
    %38 = arith.subf %36, %37 : vector<1x128xf32>
    %39 = vector.broadcast %35 : vector<1x128xf32> to vector<32x128xf32>
    %40 = arith.mulf %19, %39 : vector<32x128xf32>
    %41 = vector.broadcast %38 : vector<1x128xf32> to vector<32x128xf32>
    %42 = arith.addf %40, %41 : vector<32x128xf32>
    %cst_33 = arith.constant 0.000000e+00 : f32
    %43 = vector.broadcast %cst_33 : f32 to vector<32x128xf32>
    %44 = arith.maximumf %42, %43 : vector<32x128xf32>
    %cst_34 = arith.constant 0.000000e+00 : bf16
    %45 = vector.broadcast %cst_34 : bf16 to vector<2x1x128xbf16>
    %c0_35 = arith.constant 0 : index
    %c0_36 = arith.constant 0 : index
    %c0_37 = arith.constant 0 : index
    %46 = vector.load %arg9[%c0_35, %c0_36, %c0_37] : memref<2x18x128xbf16, #tpu.memory_space<vmem>>, vector<2x1x128xbf16>
    tpu.vector_store %arg9[%c0_35, %c0_36, %c0_37], %45 {strides = array<i32>} : memref<2x18x128xbf16, #tpu.memory_space<vmem>>, vector<2x1x128xbf16>,
    %c0_38 = arith.constant 0 : index
    %c17 = arith.constant 17 : index
    %c0_39 = arith.constant 0 : index
    %47 = vector.load %arg9[%c0_38, %c17, %c0_39] : memref<2x18x128xbf16, #tpu.memory_space<vmem>>, vector<2x1x128xbf16>
    tpu.vector_store %arg9[%c0_38, %c17, %c0_39], %45 {strides = array<i32>} : memref<2x18x128xbf16, #tpu.memory_space<vmem>>, vector<2x1x128xbf16>,
    %48 = vector.shape_cast %44 : vector<32x128xf32> to vector<2x16x128xf32>
    %49 = arith.truncf %48 : vector<2x16x128xf32> to vector<2x16x128xbf16>
    %c0_40 = arith.constant 0 : index
    %c1_41 = arith.constant 1 : index
    %c0_42 = arith.constant 0 : index
    %50 = vector.load %arg9[%c0_40, %c1_41, %c0_42] : memref<2x18x128xbf16, #tpu.memory_space<vmem>>, vector<2x16x128xbf16>
    tpu.vector_store %arg9[%c0_40, %c1_41, %c0_42], %49 {strides = array<i32>} : memref<2x18x128xbf16, #tpu.memory_space<vmem>>, vector<2x16x128xbf16>,
    %c0_43 = arith.constant 0 : index
    %c0_44 = arith.constant 0 : index
    %c0_45 = arith.constant 0 : index
    %51 = vector.load %arg9[%c0_43, %c0_44, %c0_45] : memref<2x18x128xbf16, #tpu.memory_space<vmem>>, vector<2x16x128xbf16>
    %52 = vector.shape_cast %51 : vector<2x16x128xbf16> to vector<32x128xbf16>
    %c0_46 = arith.constant 0 : index
    %c0_47 = arith.constant 0 : index
    %c0_48 = arith.constant 0 : index
    %53 = vector.load %arg2[%c0_46, %c0_47, %c0_48] : memref<3x128x128xbf16, #tpu.memory_space<vmem>>, vector<1x128x128xbf16>
    %54 = vector.shape_cast %53 : vector<1x128x128xbf16> to vector<128x128xbf16>
    %cst_49 = arith.constant dense<0.000000e+00> : vector<32x128xf32>
    %55 = tpu.matmul %52, %54, %cst_49 {dimension_numbers = #tpu.dot_dimension_numbers<[1], [0], [0], [1], [0, 0, 1, 1], [], []>} : vector<32x128xbf16>, vector<128x128xbf16>, vector<32x128xf32> -> vector<32x128xf32>
    %c0_50 = arith.constant 0 : index
    %c1_51 = arith.constant 1 : index
    %c0_52 = arith.constant 0 : index
    %56 = vector.load %arg9[%c0_50, %c1_51, %c0_52] : memref<2x18x128xbf16, #tpu.memory_space<vmem>>, vector<2x16x128xbf16>
    %57 = vector.shape_cast %56 : vector<2x16x128xbf16> to vector<32x128xbf16>
    %c1_53 = arith.constant 1 : index
    %c0_54 = arith.constant 0 : index
    %c0_55 = arith.constant 0 : index
    %58 = vector.load %arg2[%c1_53, %c0_54, %c0_55] : memref<3x128x128xbf16, #tpu.memory_space<vmem>>, vector<1x128x128xbf16>
    %59 = vector.shape_cast %58 : vector<1x128x128xbf16> to vector<128x128xbf16>
    %cst_56 = arith.constant dense<0.000000e+00> : vector<32x128xf32>
    %60 = tpu.matmul %57, %59, %cst_56 {dimension_numbers = #tpu.dot_dimension_numbers<[1], [0], [0], [1], [0, 0, 1, 1], [], []>} : vector<32x128xbf16>, vector<128x128xbf16>, vector<32x128xf32> -> vector<32x128xf32>
    %61 = arith.addf %55, %60 : vector<32x128xf32>
    %c0_57 = arith.constant 0 : index
    %c2_58 = arith.constant 2 : index
    %c0_59 = arith.constant 0 : index
    %62 = vector.load %arg9[%c0_57, %c2_58, %c0_59] : memref<2x18x128xbf16, #tpu.memory_space<vmem>>, vector<2x16x128xbf16>
    %63 = vector.shape_cast %62 : vector<2x16x128xbf16> to vector<32x128xbf16>
    %c2_60 = arith.constant 2 : index
    %c0_61 = arith.constant 0 : index
    %c0_62 = arith.constant 0 : index
    %64 = vector.load %arg2[%c2_60, %c0_61, %c0_62] : memref<3x128x128xbf16, #tpu.memory_space<vmem>>, vector<1x128x128xbf16>
    %65 = vector.shape_cast %64 : vector<1x128x128xbf16> to vector<128x128xbf16>
    %cst_63 = arith.constant dense<0.000000e+00> : vector<32x128xf32>
    %66 = tpu.matmul %63, %65, %cst_63 {dimension_numbers = #tpu.dot_dimension_numbers<[1], [0], [0], [1], [0, 0, 1, 1], [], []>} : vector<32x128xbf16>, vector<128x128xbf16>, vector<32x128xf32> -> vector<32x128xf32>
    %67 = arith.addf %61, %66 : vector<32x128xf32>
    %cst_64 = arith.constant dense<0.000000e+00> : vector<128xf32>
    %68 = vector.multi_reduction <add>, %67, %cst_64 [0] : vector<32x128xf32> to vector<128xf32>
    %69 = vector.shape_cast %68 : vector<128xf32> to vector<1x128xf32>
    %70 = arith.mulf %67, %67 : vector<32x128xf32>
    %cst_65 = arith.constant dense<0.000000e+00> : vector<128xf32>
    %71 = vector.multi_reduction <add>, %70, %cst_65 [0] : vector<32x128xf32> to vector<128xf32>
    %72 = vector.shape_cast %71 : vector<128xf32> to vector<1x128xf32>
    %c0_66 = arith.constant 0 : index
    %c0_67 = arith.constant 0 : index
    %73 = vector.load %arg7[%c0_66, %c0_67] : memref<128x128xf32, #tpu.memory_space<vmem>>, vector<128x128xf32>
    %cst_68 = arith.constant dense<0.000000e+00> : vector<1x128xf32>
    %74 = tpu.matmul %69, %73, %cst_68 {dimension_numbers = #tpu.dot_dimension_numbers<[1], [0], [0], [1], [0, 0, 1, 1], [], []>} : vector<1x128xf32>, vector<128x128xf32>, vector<1x128xf32> -> vector<1x128xf32>
    %c0_69 = arith.constant 0 : index
    %c0_70 = arith.constant 0 : index
    %75 = vector.load %arg7[%c0_69, %c0_70] : memref<128x128xf32, #tpu.memory_space<vmem>>, vector<128x128xf32>
    %cst_71 = arith.constant dense<0.000000e+00> : vector<1x128xf32>
    %76 = tpu.matmul %72, %75, %cst_71 {dimension_numbers = #tpu.dot_dimension_numbers<[1], [0], [0], [1], [0, 0, 1, 1], [], []>} : vector<1x128xf32>, vector<128x128xf32>, vector<1x128xf32> -> vector<1x128xf32>
    %77 = arith.mulf %74, %74 : vector<1x128xf32>
    %78 = arith.subf %76, %77 : vector<1x128xf32>
    %c0_72 = arith.constant 0 : index
    %c0_73 = arith.constant 0 : index
    %79 = vector.load %arg5[%c0_72, %c0_73] : memref<1x128xf32, #tpu.memory_space<vmem>>, vector<1x128xf32>
    %cst_74 = arith.constant 9.99999974E-6 : f32
    %80 = vector.broadcast %cst_74 : f32 to vector<1x128xf32>
    %81 = arith.addf %78, %80 : vector<1x128xf32>
    %82 = math.rsqrt %81 : vector<1x128xf32>
    %83 = arith.mulf %79, %82 : vector<1x128xf32>
    %c0_75 = arith.constant 0 : index
    %c0_76 = arith.constant 0 : index
    %84 = vector.load %arg6[%c0_75, %c0_76] : memref<1x128xf32, #tpu.memory_space<vmem>>, vector<1x128xf32>
    %85 = arith.mulf %74, %83 : vector<1x128xf32>
    %86 = arith.subf %84, %85 : vector<1x128xf32>
    %87 = vector.broadcast %83 : vector<1x128xf32> to vector<32x128xf32>
    %88 = arith.mulf %67, %87 : vector<32x128xf32>
    %89 = vector.broadcast %86 : vector<1x128xf32> to vector<32x128xf32>
    %90 = arith.addf %88, %89 : vector<32x128xf32>
    %cst_77 = arith.constant 0.000000e+00 : f32
    %91 = vector.broadcast %cst_77 : f32 to vector<32x128xf32>
    %92 = arith.maximumf %90, %91 : vector<32x128xf32>
    %c0_78 = arith.constant 0 : index
    %c0_79 = arith.constant 0 : index
    %93 = vector.load %arg8[%c0_78, %c0_79] : memref<32x128xf32, #tpu.memory_space<vmem>>, vector<32x128xf32>
    tpu.vector_store %arg8[%c0_78, %c0_79], %92 {strides = array<i32>} : memref<32x128xf32, #tpu.memory_space<vmem>>, vector<32x128xf32>,
    return
  }
}

</mosaic_0001>

<bundles_post_ra>
// kernel: tpu_custom_call.1
= control target key start
LH: loop header
LB: loop body
LE: loop exit
PB: predicated region body
PF: predicated region fallthrough
CT: control target
= control target key end

     0   :  { %13 = vsyncpa [#allocation4], 0  ;;  %s1651_s0 = inlined_call_operand.hbm [shape: bf16[3,2,16,64], index: 0, kind: input, shape index: {}]   ;;  %s1652_s1 = inlined_call_operand.hbm [shape: bf16[3,64,128], index: 1, kind: input, shape index: {}]   ;;  %s1653_s2 = inlined_call_operand.hbm [shape: bf16[3,128,128], index: 2, kind: input, shape index: {}]   ;;  %s1654_s3 = inlined_call_operand.vmem [shape: f32[1,128], index: 3, kind: input, shape index: {}]   ;;  %s1655_s4 = inlined_call_operand.vmem [shape: f32[1,128], index: 4, kind: input, shape index: {}]   ;;  %s1656_s5 = inlined_call_operand.vmem [shape: f32[1,128], index: 5, kind: input, shape index: {}]   ;;  %s1657_s6 = inlined_call_operand.vmem [shape: f32[1,128], index: 6, kind: input, shape index: {}]   ;;  %s1658_s7 = inlined_call_operand.hbm [shape: f32[128,128], index: 7, kind: input, shape index: {}]   ;;  %s1659_s8 = inlined_call_operand.hbm [shape: f32[32,128], index: 8, kind: output, shape index: {}]  }
   0x1   :  { %14 = vsyncpa [#allocation7], 0 }
   0x2   :  { %15 = vsyncpa [#allocation10], 0 }
   0x3   :  { %16 = vsyncpa [#allocation5], 0  ;;  %s34_s29 = sshll.u32 %s1652_s1, 4  ;;  %s1380_s30 = smov [#allocation6]   ;;  %s35_s29 = int_to_ptr.hbm [resolvable:$true] %s34_s29 }
   0x4   :  { %s36_s9 = sshll.u32 %s1380_s30, 4  ;;  %s21_s12 = sshll.u32 %s1651_s0, 4  ;;  %s37_s9 = int_to_ptr.vmem [resolvable:$true] %s36_s9  ;;  %s22_s12 = int_to_ptr.hbm [resolvable:$true] %s21_s12 }
   0x5   :  { %s1381_s13 = smov 64   ;;  %s1382_s14 = smov 4  }
   0x6   :  { %42 = dma.hbm_to_vmem [thread:$0]  %s35_s29, 1536, %s37_s9, [#allocation7], %s1381_s13, %s1381_s13, %s1382_s14  }
   0x7   :  { %s1383_s15 = smov [#allocation3]   ;;  %s47_s19 = sshll.u32 %s1653_s2, 4  ;;  %s48_s19 = int_to_ptr.hbm [resolvable:$true] %s47_s19 }
   0x8   :  { %s23_s16 = sshll.u32 %s1383_s15, 4  ;;  %s68_s21 = sshll.u32 %s1658_s7, 4  ;;  %s24_s16 = int_to_ptr.vmem [resolvable:$true] %s23_s16  ;;  %s69_s21 = int_to_ptr.hbm [resolvable:$true] %s68_s21 }
   0x9   :  { %29 = dma.hbm_to_vmem [thread:$0]  %s22_s12, 768, %s24_s16, [#allocation4], %s1381_s13, %s1381_s13, %s1382_s14  }
   0xa   :  { %s1384_s22 = smov [#allocation8]   ;;  %s1385_s0 = smov [#allocation9]  }
   0xb   :  { %s49_s23 = sshll.u32 %s1384_s22, 4  ;;  %s70_s24 = sshll.u32 %s1385_s0, 4  ;;  %s50_s23 = int_to_ptr.vmem [resolvable:$true] %s49_s23  ;;  %s71_s24 = int_to_ptr.vmem [resolvable:$true] %s70_s24 }
   0xc   :  { %55 = dma.hbm_to_vmem [thread:$0]  %s48_s19, 3072, %s50_s23, [#allocation7], %s1381_s13, %s1381_s13, %s1382_s14  }
   0xd   :  { %s1386_s25 = smov 128   ;;  %s1387_s26 = smov 8  }
   0xe   :  { %76 = dma.hbm_to_vmem [thread:$0]  %s69_s21, 2048, %s71_s24, [#allocation10], %s1386_s25, %s1386_s25, %s1387_s26  }
   0xf   :  { %1372 = dma.done.wait [#allocation4], 768  }
  0x10   :  { %1373 = vsyncadd [#allocation4], 4294966528 }
  0x11   :  { %1374 = dma.done.wait [#allocation7], 4608  }
  0x12   :  { %1375 = vsyncadd [#allocation7], 4294962688 }
  0x13   :  { %1376 = dma.done.wait [#allocation10], 2048  }
  0x14   :  { %1377 = vsyncadd [#allocation10], 4294965248  ;;  %v1206_v0 = vld [vmem:[#allocation6 + $0x38] sm:$0xff]  ;;  %v1205_v3 = vld [vmem:[#allocation6 + $0x30] sm:$0xff]  ;;  %vm154_vm0 = vcmask 523264   ;;  %vm430_vm1 = vcmask 1040384  }
  0x15   :  { %v1200_v1 = vld [vmem:[#allocation6 + $0x18] sm:$0xff]  ;;  %165 = vmatpush.bf16.msra.mxu0 %v1206_v0  ;;  %v1199_v4 = vld [vmem:[#allocation6 + $0x10] sm:$0xff]  ;;  %v1204_v6 = vld [vmem:[#allocation6 + $0x28] sm:$0xff]  ;;  %vm431_vm2 = vsmask.f32 256  ;;  %vm493_vm10 = vcmask 1043456  }
  0x16   :  { %v1212_v2 = vld [vmem:[#allocation6 + $0x58] sm:$0xff]  ;;  %224 = vmatpush.bf16.msra.mxu1 %v1200_v1  ;;  %v1211_v5 = vld [vmem:[#allocation6 + $0x50] sm:$0xff]  ;;  %v1198_v7 = vld [vmem:[#allocation6 + $0x8] sm:$0xff]  ;;  %vm439_vm4 = vsmask.f32 7938  ;;  %vm759_vm13 = vcmask 1042432  }
  0x17   :  { %297 = vmatpush.bf16.msra.mxu2 %v1212_v2  ;;  %v1210_v8 = vld [vmem:[#allocation6 + $0x48] sm:$0xff]  ;;  %v1203_v9 = vld [vmem:[#allocation6 + $0x20] sm:$0xff]  ;;  %v1195_v13 = vld [vmem:[#allocation3] sm:$0xff]  ;;  %vm451_vm9 = vsmask.f32 4368  ;;  %vm760_vm14 = vcmask 1046532  }
  0x18   :  { %v1197_v10 = vld [vmem:[#allocation6] sm:$0xff]  ;;  %v1207_v14 = vld [vmem:[#allocation3 + $0x20] sm:$0xff]  ;;  %v1202_v15 = vld [vmem:[#allocation3 + $0x18] sm:$0xff]  ;;  %vm531_vm15 = vsmask.f32 3328 }
  0x19   :  { %166 = vmatpush.bf16.msra.mxu0 %v1205_v3  ;;  %v1209_v11 = vld [vmem:[#allocation6 + $0x40] sm:$0xff]  ;;  %v1196_v16 = vld [vmem:[#allocation3 + $0x8] sm:$0xff]  ;;  %v1453_v19 = vld [vmem:[#allocation9 + $0x70] sm:$0xff] }
  0x1a   :  { %225 = vmatpush.bf16.msra.mxu1 %v1199_v4  ;;  %v1201_v12 = vld [vmem:[#allocation3 + $0x10] sm:$0xff]  ;;  %v1208_v17 = vld [vmem:[#allocation3 + $0x28] sm:$0xff]  ;;  %v1457_v20 = vld [vmem:[#allocation9 + $0x68] sm:$0xff] }
  0x1b   :  { %298 = vmatpush.bf16.msra.mxu2 %v1211_v5  ;;  %v1449_v18 = vld [vmem:[#allocation9 + $0x78] sm:$0xff]  ;;  %v1461_v21 = vld [vmem:[#allocation9 + $0x60] sm:$0xff]  ;;  %v1469_v23 = vld [vmem:[#allocation9 + $0x50] sm:$0xff] }
  0x1c   :  { %354 = vmatpush.msra.mxu3 %v1449_v18  ;;  %v1465_v22 = vld [vmem:[#allocation9 + $0x58] sm:$0xff]  ;;  %v1473_v24 = vld [vmem:[#allocation9 + $0x48] sm:$0xff]  ;;  %v1477_v25 = vld [vmem:[#allocation9 + $0x40] sm:$0xff] }
  0x1d   :  { %167 = vmatpush.bf16.msra.mxu0 %v1204_v6  ;;  %v1481_v28 = vld [vmem:[#allocation9 + $0x38] sm:$0xff]  ;;  %v1485_v29 = vld [vmem:[#allocation9 + $0x30] sm:$0xff]  ;;  %v1489_v30 = vld [vmem:[#allocation9 + $0x28] sm:$0xff] }
  0x1e   :  { %226 = vmatpush.bf16.msra.mxu1 %v1198_v7  ;;  %355 = vmatpush.msra.mxu3 %v1453_v19  ;;  %v1493_v31 = vld [vmem:[#allocation9 + $0x20] sm:$0xff]  ;;  %v1495_v32 = vld [vmem:[#allocation9 + $0x18] sm:$0xff]  ;;  %v1499_v36 = vld [vmem:[#allocation9 + $0x10] sm:$0xff] }
  0x1f   :  { %299 = vmatpush.bf16.msra.mxu2 %v1210_v8  ;;  %v1503_v37 = vld [vmem:[#allocation9 + $0x8] sm:$0xff]  ;;  %v1507_v38 = vld [vmem:[#allocation9] sm:$0xff]  ;;  %vm1554_vm3 = vmand %vm430_vm1, %vm431_vm2 }
  0x20   :  { %356 = vmatpush.msra.mxu3 %v1457_v20  ;;  %vm440_vm5 = vmand %vm430_vm1, %vm439_vm4 }
  0x21   :  { %168 = vmatpush.bf16.msra.mxu0 %v1203_v9  ;;  %vm1576_vm11 = vmor %vm431_vm2, %vm451_vm9 }
  0x22   :  { %227 = vmatpush.bf16.msra.mxu1 %v1197_v10  ;;  %357 = vmatpush.msra.mxu3 %v1461_v21  ;;  %vm1583_vm12 = vmand %vm493_vm10, %vm439_vm4 }
  0x23   :  { %300 = vmatpush.bf16.msra.mxu2 %v1209_v11  ;;  %vm1605_vm1 = vmor %vm759_vm13, %vm760_vm14 }
  0x24   :  { %1035 = vmatmul.msk.bf16.vlgmr.msra.gmra.mxu0 %vm154_vm0, %v1201_v12  ;;  %358 = vmatpush.msra.mxu3 %v1465_v22  ;;  %v1222_v12 = vld [vmem:[#allocation8 + $0x38] sm:$0xff] }
  0x25   :  { %1061 = vmatmul.msk.bf16.vlgmr.msra.gmra.mxu1 %vm154_vm0, %v1195_v13  ;;  %374 = vmatpush.msrb.mxu0 %v1449_v18  ;;  %v1221_v13 = vld [vmem:[#allocation8 + $0x30] sm:$0xff] }
  0x26   :  { %1087 = vmatmul.msk.bf16.vlgmr.msra.gmra.mxu2 %vm154_vm0, %v1207_v14  ;;  %359 = vmatpush.msra.mxu3 %v1469_v23 }
  0x27   :  { %375 = vmatpush.msrb.mxu0 %v1453_v19  ;;  %734 = vmatpush.bf16.msrb.mxu2 %v1222_v12  ;;  %v1232_v12 = vld [vmem:[#allocation8 + $0x88] sm:$0xff] }
  0x28   :  { %360 = vmatpush.msra.mxu3 %v1473_v24 }
  0x29   :  { %376 = vmatpush.msrb.mxu0 %v1457_v20 }
  0x2a   :  { %361 = vmatpush.msra.mxu3 %v1477_v25 }
  0x2b   :  { %377 = vmatpush.msrb.mxu0 %v1461_v21  ;;  %735 = vmatpush.bf16.msrb.mxu2 %v1221_v13 }
  0x2c   :  { %362 = vmatpush.msra.mxu3 %v1481_v28 }
  0x2d   :  { %378 = vmatpush.msrb.mxu0 %v1465_v22 }
  0x2e   :  { %363 = vmatpush.msra.mxu3 %v1485_v29 }
  0x2f   :  { %379 = vmatpush.msrb.mxu0 %v1469_v23 }
  0x30   :  { %364 = vmatpush.msra.mxu3 %v1489_v30 }
  0x31   :  { %380 = vmatpush.msrb.mxu0 %v1473_v24 }
  0x32   :  { %365 = vmatpush.msra.mxu3 %v1493_v31 }
  0x33   :  { %381 = vmatpush.msrb.mxu0 %v1477_v25 }
  0x34   :  { %1036 = vmatmul.msk.bf16.gmra.mxu0 %vm154_vm0, %v1202_v15  ;;  %366 = vmatpush.msra.mxu3 %v1495_v32 }
  0x35   :  { %1062 = vmatmul.msk.bf16.gmra.mxu1 %vm154_vm0, %v1196_v16  ;;  %382 = vmatpush.msrb.mxu0 %v1481_v28 }
  0x36   :  { %1088 = vmatmul.msk.bf16.gmra.mxu2 %vm154_vm0, %v1208_v17  ;;  %367 = vmatpush.msra.mxu3 %v1499_v36  ;;  %vm532_vm0 = vsmask.f32 7440 }
  0x37   :  { %383 = vmatpush.msrb.mxu0 %v1485_v29  ;;  %vm1617_vm2 = vmor %vm531_vm15, %vm532_vm0 }
  0x38   :  { %368 = vmatpush.msra.mxu3 %v1503_v37 }
  0x39   :  { %384 = vmatpush.msrb.mxu0 %v1489_v30 }
  0x3a   :  { %369 = vmatpush.msra.mxu3 %v1507_v38 }
  0x3b   :  { %385 = vmatpush.msrb.mxu0 %v1493_v31 }
  0x3d   :  { %386 = vmatpush.msrb.mxu0 %v1495_v32 }
  0x3f   :  { %387 = vmatpush.msrb.mxu0 %v1499_v36 }
  0x41   :  { %388 = vmatpush.msrb.mxu0 %v1503_v37 }
  0x43   :  { %389 = vmatpush.msrb.mxu0 %v1507_v38 }
  0x45   :  { %910 = vmatpush.msra.mxu0 %v1449_v18 }
  0x47   :  { %911 = vmatpush.msra.mxu0 %v1453_v19 }
  0x49   :  { %912 = vmatpush.msra.mxu0 %v1457_v20 }
  0x4b   :  { %913 = vmatpush.msra.mxu0 %v1461_v21 }
  0x4d   :  { %914 = vmatpush.msra.mxu0 %v1465_v22 }
  0x4f   :  { %915 = vmatpush.msra.mxu0 %v1469_v23 }
  0x51   :  { %916 = vmatpush.msra.mxu0 %v1473_v24 }
  0x53   :  { %917 = vmatpush.msra.mxu0 %v1477_v25 }
  0x55   :  { %918 = vmatpush.msra.mxu0 %v1481_v28 }
  0x57   :  { %919 = vmatpush.msra.mxu0 %v1485_v29 }
  0x59   :  { %920 = vmatpush.msra.mxu0 %v1489_v30 }
  0x5b   :  { %921 = vmatpush.msra.mxu0 %v1493_v31 }
  0x5d   :  { %922 = vmatpush.msra.mxu0 %v1495_v32 }
  0x5f   :  { %923 = vmatpush.msra.mxu0 %v1499_v36 }
  0x61   :  { %924 = vmatpush.msra.mxu0 %v1503_v37 }
  0x63   :  { %925 = vmatpush.msra.mxu0 %v1507_v38 }
  0xa1   :  { %v170_v26 = vpop.f32.mrf.mxu0 }
  0xa2   :  { %v229_v27 = vpop.f32.mrf.mxu1 }
  0xa3   :  { %v230_v42 = vadd.f32 %v229_v27, %v170_v26  ;;  %v433_v26 = vld [vmem:[#allocation2] sm:$0x1] }
  0xa4   :  { %v1238_v27 = vld [vmem:[#allocation8 + $0xb8] sm:$0xff] }
  0xa5   :  { %849 = vmatpush.bf16.msrb.mxu3 %v1238_v27  ;;  %v1231_v27 = vld [vmem:[#allocation8 + $0x80] sm:$0xff] }
  0xa9   :  { %v302_v33 = vpop.f32.mrf.mxu2  ;;  %v172_v34 = vpop.f32.mrf.mxu0 }
  0xaa   :  { %v231_v35 = vpop.f32.mrf.mxu1  ;;  %v1520_v47 = vadd.f32 %v302_v33, %v230_v42  ;;  %v444_v42 = vld [vmem:[#allocation2 + $0x14] sm:$0x1] }
  0xab   :  { %v232_v43 = vadd.f32 %v231_v35, %v172_v34  ;;  %v436_v34 = vld [vmem:[#allocation2 + $0xc] sm:$0x1]  ;;  %v441_v35 = vld [vmem:[#allocation2 + $0x8] sm:$0x1] }
  0xac   :  { %v325_v52 = vmul.f32 %v1520_v47, %v1520_v47 }
  0xb1   :  { %v304_v39 = vpop.f32.mrf.mxu2  ;;  %v175_v40 = vpop.f32.mrf.mxu0 }
  0xb2   :  { %v234_v41 = vpop.f32.mrf.mxu1  ;;  %v1517_v46 = vadd.f32 %v304_v39, %v232_v43  ;;  %v442_v43 = vsel %vm440_vm5, 0, %v441_v35 }
  0xb3   :  { %v235_v44 = vadd.f32 %v234_v41, %v175_v40  ;;  %v434_v40 = vsel %vm1554_vm3, 0, %v433_v26  ;;  %v437_v41 = vsel %vm1554_vm3, 0, %v436_v34  ;;  %443 = vst [vmem:[#allocation2 + $0x8] sm:$0x1] %v442_v43  ;;  %v1224_v26 = vld [vmem:[#allocation8 + $0x48] sm:$0xff] }
  0xb4   :  { %v326_v51 = vmul.f32 %v1517_v46, %v1517_v46  ;;  %v316_v53 = vadd.f32 %v1517_v46, %v1520_v47  ;;  %435 = vst [vmem:[#allocation2] sm:$0x1] %v434_v40 }
  0xb5   :  { %438 = vst [vmem:[#allocation2 + $0xc] sm:$0x1] %v437_v41 }
  0xb6   :  { %v329_v57 = vadd.f32 %v326_v51, %v325_v52  ;;  %v1219_v51 = vld [vmem:[#allocation8 + $0x20] sm:$0xff]  ;;  %v1229_v52 = vld [vmem:[#allocation8 + $0x70] sm:$0xff] }
  0xb9   :  { %v307_v45 = vpop.f32.mrf.mxu2  ;;  %v177_v49 = vpop.f32.mrf.mxu0 }
  0xba   :  { %v1522_v48 = vadd.f32 %v307_v45, %v235_v44  ;;  %v236_v50 = vpop.f32.mrf.mxu1  ;;  %v445_v44 = vsel %vm440_vm5, 0, %v444_v42  ;;  %v1220_v45 = vld [vmem:[#allocation8 + $0x28] sm:$0xff] }
  0xbb   :  { %v237_v55 = vadd.f32 %v236_v50, %v177_v49  ;;  %v1230_v49 = vld [vmem:[#allocation8 + $0x78] sm:$0xff]  ;;  %v1237_v50 = vld [vmem:[#allocation8 + $0xb0] sm:$0xff]  ;;  %446 = vst [vmem:[#allocation2 + $0x14] sm:$0x1] %v445_v44  ;;  %736 = vmatpush.bf16.msrb.mxu2 %v1220_v45  ;;  %v1223_v44 = vld [vmem:[#allocation8 + $0x40] sm:$0xff] }
  0xbc   :  { %v327_v54 = vmul.f32 %v1522_v48, %v1522_v48  ;;  %v317_v58 = vadd.f32 %v316_v53, %v1522_v48  ;;  %655 = vmatpush.bf16.msrb.mxu1 %v1230_v49  ;;  %850 = vmatpush.bf16.msrb.mxu3 %v1237_v50  ;;  %v1236_v53 = vld [vmem:[#allocation8 + $0xa8] sm:$0xff] }
  0xbe   :  { %v330_v60 = vadd.f32 %v329_v57, %v327_v54  ;;  %v1228_v57 = vld [vmem:[#allocation8 + $0x68] sm:$0xff] }
  0xbf   :  { %737 = vmatpush.bf16.msrb.mxu2 %v1219_v51 }
  0xc0   :  { %656 = vmatpush.bf16.msrb.mxu1 %v1229_v52  ;;  %851 = vmatpush.bf16.msrb.mxu3 %v1236_v53 }
  0xc1   :  { %v309_v56 = vpop.f32.mrf.mxu2 }
  0xc2   :  { %v1536_v59 = vadd.f32 %v309_v56, %v237_v55  ;;  %v1218_v55 = vld [vmem:[#allocation8 + $0x18] sm:$0xff] }
  0xc3   :  { %738 = vmatpush.bf16.msrb.mxu2 %v1218_v55 }
  0xc4   :  { %v318_v61 = vadd.f32 %v317_v58, %v1536_v59  ;;  %v328_v62 = vmul.f32 %v1536_v59, %v1536_v59  ;;  %657 = vmatpush.bf16.msrb.mxu1 %v1228_v57 }
  0xc6   :  { %v319_v63 = vrot.slane %v318_v61, 4  ;;  %v331_v0 = vadd.f32 %v330_v60, %v328_v62  ;;  %v1235_v60 = vld [vmem:[#allocation8 + $0xa0] sm:$0xff] }
  0xc7   :  { %852 = vmatpush.bf16.msrb.mxu3 %v1235_v60 }
  0xc8   :  { %v332_v1 = vrot.slane %v331_v0, 4  ;;  %v320_v2 = vadd.f32 %v319_v63, %v318_v61  ;;  %v1217_v61 = vld [vmem:[#allocation8 + $0x10] sm:$0xff]  ;;  %v1227_v63 = vld [vmem:[#allocation8 + $0x60] sm:$0xff] }
  0xc9   :  { %739 = vmatpush.bf16.msrb.mxu2 %v1217_v61  ;;  %658 = vmatpush.bf16.msrb.mxu1 %v1227_v63 }
  0xca   :  { %v321_v3 = vrot.slane %v320_v2, 2  ;;  %v333_v4 = vadd.f32 %v332_v1, %v331_v0  ;;  %v1234_v0 = vld [vmem:[#allocation8 + $0x98] sm:$0xff] }
  0xcb   :  { %853 = vmatpush.bf16.msrb.mxu3 %v1234_v0 }
  0xcc   :  { %v322_v5 = vadd.f32 %v321_v3, %v320_v2  ;;  %v334_v6 = vrot.slane %v333_v4, 2  ;;  %v1216_v2 = vld [vmem:[#allocation8 + $0x8] sm:$0xff]  ;;  %v1226_v3 = vld [vmem:[#allocation8 + $0x58] sm:$0xff] }
  0xcd   :  { %740 = vmatpush.bf16.msrb.mxu2 %v1216_v2  ;;  %659 = vmatpush.bf16.msrb.mxu1 %v1226_v3  ;;  %v499_v3 = vld [vmem:[#allocation2 + $0x8] sm:$0x1] }
  0xce   :  { %v323_v7 = vrot.slane %v322_v5, 1  ;;  %v335_v8 = vadd.f32 %v334_v6, %v333_v4  ;;  %v396_v4 = vld [vmem:[%s1654_s3] sm:$0x1]  ;;  %v1233_v6 = vld [vmem:[#allocation8 + $0x90] sm:$0xff] }
  0xcf   :  { %854 = vmatpush.bf16.msrb.mxu3 %v1233_v6 }
  0xd0   :  { %v324_v9 = vadd.f32 %v323_v7, %v322_v5  ;;  %v336_v10 = vrot.slane %v335_v8, 1 }
  0xd2   :  { %370 = vmatmul.f32.vlgmr.msra.gmra.mxu3 %v324_v9  ;;  %v337_v11 = vadd.f32 %v336_v10, %v335_v8  ;;  %v1215_v9 = vld [vmem:[#allocation8] sm:$0xff]  ;;  %v409_v10 = vld [vmem:[%s1655_s4] sm:$0x1] }
  0xd3   :  { %741 = vmatpush.bf16.msrb.mxu2 %v1215_v9  ;;  %855 = vmatpush.bf16.msrb.mxu3 %v1232_v12 }
  0xd4   :  { %390 = vmatmul.f32.vlgmr.msrb.gmra.mxu0 %v337_v11  ;;  %v1225_v11 = vld [vmem:[#allocation8 + $0x50] sm:$0xff] }
  0xd5   :  { %660 = vmatpush.bf16.msrb.mxu1 %v1225_v11 }
  0xd7   :  { %856 = vmatpush.bf16.msrb.mxu3 %v1231_v27 }
  0xd9   :  { %661 = vmatpush.bf16.msrb.mxu1 %v1224_v26 }
  0xdd   :  { %662 = vmatpush.bf16.msrb.mxu1 %v1223_v44 }
  0xe1   :  { %930 = vmatpush.msra.mxu1 %v1449_v18 }
  0xe3   :  { %931 = vmatpush.msra.mxu1 %v1453_v19 }
  0xe5   :  { %932 = vmatpush.msra.mxu1 %v1457_v20 }
  0xe7   :  { %933 = vmatpush.msra.mxu1 %v1461_v21 }
  0xe9   :  { %934 = vmatpush.msra.mxu1 %v1465_v22 }
  0xeb   :  { %935 = vmatpush.msra.mxu1 %v1469_v23 }
  0xed   :  { %936 = vmatpush.msra.mxu1 %v1473_v24 }
  0xef   :  { %937 = vmatpush.msra.mxu1 %v1477_v25 }
  0xf1   :  { %938 = vmatpush.msra.mxu1 %v1481_v28 }
  0xf3   :  { %939 = vmatpush.msra.mxu1 %v1485_v29 }
  0xf5   :  { %940 = vmatpush.msra.mxu1 %v1489_v30 }
  0xf7   :  { %941 = vmatpush.msra.mxu1 %v1493_v31 }
  0xf9   :  { %942 = vmatpush.msra.mxu1 %v1495_v32 }
  0xfb   :  { %943 = vmatpush.msra.mxu1 %v1499_v36 }
  0xfd   :  { %944 = vmatpush.msra.mxu1 %v1503_v37 }
  0xff   :  { %945 = vmatpush.msra.mxu1 %v1507_v38 }
 0x151   :  { %v391_v16 = vpop.f32.mrf.mxu0 }
 0x155   :  { %v1549_v14 = vpop.f32.mrf.mxu3 }
 0x156   :  { %v394_v15 = vmul.f32 %v1549_v14, %v1549_v14 }
 0x158   :  { %v395_v17 = vsub.f32 %v391_v16, %v394_v15 }
 0x15a   :  { %v397_v39 = vadd.f32 1e-05, %v395_v17 }
 0x15c   :  { %1248 = vrsqrt.f32 %v397_v39  ;;  %vm404_vm7 = vweird.f32 %v397_v39 }
 0x162   :  { %v1249_v54 = vpop.eup %1248 }
 0x163   :  { %v399_v56 = vmul.f32 %v1249_v54, %v397_v39  ;;  %vm405_vm6 = vweird.f32 %v1249_v54 }
 0x164   :  { %vm406_vm8 = vmor %vm404_vm7, %vm405_vm6 }
 0x165   :  { %v400_v58 = vmul.f32 %v1249_v54, %v399_v56 }
 0x167   :  { %v401_v62 = vmul.f32 0.5, %v400_v58 }
 0x169   :  { %v402_v1 = vsub.f32 1.5, %v401_v62  ;;  %v495_v62 = vld [vmem:[#allocation2] sm:$0xf] }
 0x16b   :  { %v403_v5 = vmul.f32 %v1249_v54, %v402_v1 }
 0x16d   :  { %v407_v7 = vsel %vm406_vm8, %v1249_v54, %v403_v5 }
 0x16e   :  { %v408_v8 = vmul.f32 %v407_v7, %v396_v4 }
 0x170   :  { %v410_v13 = vmul.f32 %v408_v8, %v1549_v14  ;;  %v413_v15 = vperm.slane %v408_v8, 0  ;;  %v502_v8 = vld [vmem:[#allocation2 + $0xc] sm:$0xf] }
 0x172   :  { %v411_v16 = vsub.f32 %v409_v10, %v410_v13  ;;  %v415_v17 = vmul.f32 %v413_v15, %v1520_v47  ;;  %v416_v34 = vmul.f32 %v413_v15, %v1517_v46  ;;  %v417_v35 = vmul.f32 %v413_v15, %v1522_v48 }
 0x173   :  { %v418_v39 = vmul.f32 %v413_v15, %v1536_v59 }
 0x174   :  { %v420_v40 = vperm.slane %v411_v16, 0  ;;  %v506_v16 = vld [vmem:[#allocation2 + $0x14] sm:$0x1] }
 0x176   :  { %v422_v41 = vadd.f32 %v420_v40, %v415_v17  ;;  %v423_v42 = vadd.f32 %v420_v40, %v416_v34  ;;  %v424_v43 = vadd.f32 %v420_v40, %v417_v35  ;;  %v425_v14 = vadd.f32 %v420_v40, %v418_v39 }
 0x178   :  { %v426_v45 = vmax.f32 %v422_v41, 0.0  ;;  %v427_v47 = vmax.f32 %v423_v42, 0.0  ;;  %v428_v49 = vmax.f32 %v424_v43, 0.0  ;;  %v429_v50 = vmax.f32 %v425_v14, 0.0 }
 0x17a   :  { %v447_v51 = vpack.c.bf16 %v426_v45, %v426_v45  ;;  %v448_v52 = vpack.c.bf16 %v427_v47, %v427_v47  ;;  %v449_v53 = vpack.c.bf16 %v428_v49, %v428_v49  ;;  %v450_v46 = vpack.c.bf16 %v429_v50, %v429_v50 }
 0x17c   :  { %v454_v48 = vshrl.u32 %v447_v51, 16  ;;  %v462_v59 = vshrl.u32 %v448_v52, 16  ;;  %v471_v54 = vshrl.u32 %v449_v53, 16  ;;  %v479_v55 = vshrl.u32 %v450_v46, 16 }
 0x17d   :  { %v457_v58 = vshll.u32 %v447_v51, 16  ;;  %v465_v61 = vshll.u32 %v448_v52, 16  ;;  %v474_v0 = vshll.u32 %v449_v53, 16  ;;  %v482_v2 = vshll.u32 %v450_v46, 16 }
 0x17e   :  { %v456_v57 = vrot.slane %v454_v48, 7  ;;  %v464_v60 = vrot.slane %v462_v59, 7  ;;  %v473_v63 = vrot.slane %v471_v54, 7  ;;  %v481_v1 = vrot.slane %v479_v55, 7 }
 0x180   :  { %v459_v4 = vor.u32 %v457_v58, %v456_v57  ;;  %v460_v5 = vrot.slane %v456_v57, 4  ;;  %v467_v6 = vor.u32 %v465_v61, %v464_v60  ;;  %v469_v7 = vrot.slane %v464_v60, 4 }
 0x181   :  { %v476_v9 = vor.u32 %v474_v0, %v473_v63  ;;  %v477_v19 = vrot.slane %v473_v63, 4  ;;  %v484_v10 = vor.u32 %v482_v2, %v481_v1  ;;  %v486_v11 = vrot.slane %v481_v1, 4 }
 0x182   :  { %v468_v12 = vsel %vm1576_vm11, %v460_v5, %v467_v6  ;;  %v496_v13 = vsel %vm1583_vm12, %v459_v4, %v495_v62  ;;  %v500_v15 = vsel %vm1554_vm3, %v469_v7, %v499_v3 }
 0x183   :  { %497 = vst [vmem:[#allocation2] sm:$0xf] %v496_v13  ;;  %v503_v20 = vsel %vm1583_vm12, %v476_v9, %v502_v8  ;;  %v485_v17 = vsel %vm1576_vm11, %v477_v19, %v484_v10  ;;  %v507_v26 = vsel %vm1554_vm3, %v486_v11, %v506_v16 }
 0x184   :  { %498 = vst [vmem:[#allocation2 + $0x4] sm:$0xf] %v468_v12 }
 0x185   :  { %501 = vst [vmem:[#allocation2 + $0x8] sm:$0x1] %v500_v15 }
 0x186   :  { %504 = vst [vmem:[#allocation2 + $0xc] sm:$0xf] %v503_v20 }
 0x187   :  { %505 = vst [vmem:[#allocation2 + $0x10] sm:$0xf] %v485_v17 }
 0x188   :  { %508 = vst [vmem:[#allocation2 + $0x14] sm:$0x1] %v507_v26 }
 0x18a   :  { %v753_v21 = vld [vmem:[#allocation2] sm:$0xe] }
 0x18b   :  { %v509_v27 = vld [vmem:[#allocation2] sm:$0xf]  ;;  %v510_v34 = vld [vmem:[#allocation2 + $0x4] sm:$0xf]  ;;  %v1161_v35 = vrot.slane %v753_v21, 9 }
 0x18c   :  { %v1213_v22 = vld [vmem:[#allocation2] sm:$0xff]  ;;  %v535_v23 = vshrl.u32 %v509_v27, 16  ;;  %v538_v39 = vshll.u32 %v509_v27, 16  ;;  %v529_v40 = vld [vmem:[#allocation2 + $0x8] sm:$0x1]  ;;  %v764_v41 = vrot.slane %v510_v34, 5 }
 0x18d   :  { %v544_v42 = vshll.u32 %v510_v34, 16  ;;  %v548_v43 = vshrl.u32 %v510_v34, 16  ;;  %742 = vmatmul.bf16.vlgmr.msrb.gmra.mxu2 %v1213_v22  ;;  %v767_v24 = vrot.slane %v529_v40, 5  ;;  %v554_v25 = vshll.u32 %v529_v40, 16  ;;  %v511_v53 = vld [vmem:[#allocation2 + $0xc] sm:$0xf] }
 0x18e   :  { %v537_v14 = vrot.slane %v535_v23, 4  ;;  %v540_v44 = vrot.slane %v538_v39, 5  ;;  %v765_v45 = vsel %vm1605_vm1, %v1161_v35, %v764_v41  ;;  %v766_v47 = vrot.slane %v764_v41, 4  ;;  %v512_v52 = vld [vmem:[#allocation2 + $0x10] sm:$0xf] }
 0x18f   :  { %v546_v49 = vrot.slane %v544_v42, 5  ;;  %v550_v50 = vrot.slane %v548_v43, 4  ;;  %v793_v28 = vunpack.c.l.b16 %v765_v45  ;;  %v559_v56 = vshrl.u32 %v511_v53, 16  ;;  %v530_v5 = vld [vmem:[#allocation2 + $0x14] sm:$0x1]  ;;  %v1214_v32 = vld [vmem:[#allocation2 + $0xc] sm:$0xff] }
 0x190   :  { %v541_v51 = vor.u32 %v540_v44, %v537_v14  ;;  %v768_v46 = vsel %vm1605_vm1, %v766_v47, %v767_v24  ;;  %v562_v29 = vshll.u32 %v511_v53, 16  ;;  %v556_v58 = vrot.slane %v554_v25, 5  ;;  %v754_v6 = vld [vmem:[#allocation2 + $0xc] sm:$0xe] }
 0x191   :  { %v551_v59 = vor.u32 %v550_v50, %v546_v49  ;;  %v794_v54 = vunpack.c.l.b16 %v768_v46  ;;  %v568_v60 = vshll.u32 %v512_v52, 16  ;;  %v771_v63 = vrot.slane %v512_v52, 5 }
 0x192   :  { %v542_v55 = vrot.slane %v541_v51, 4  ;;  %v561_v2 = vrot.slane %v559_v56, 4  ;;  %v564_v30 = vrot.slane %v562_v29, 5  ;;  %v572_v4 = vshrl.u32 %v512_v52, 16 }
 0x193   :  { %v552_v57 = vrot.slane %v551_v59, 4  ;;  %v797_v61 = vpack.c.b16 %v794_v54, %v793_v28  ;;  %v570_v3 = vrot.slane %v568_v60, 5  ;;  %v773_v8 = vrot.slane %v771_v63, 4 }
 0x194   :  { %v547_v62 = vsel %vm1617_vm2, %v542_v55, %v546_v49  ;;  %v574_v7 = vrot.slane %v572_v4, 4  ;;  %v565_v9 = vor.u32 %v564_v30, %v561_v2  ;;  %v1162_v10 = vrot.slane %v754_v6, 9 }
 0x195   :  { %v557_v0 = vsel %vm1617_vm2, %v552_v57, %v556_v58  ;;  %v599_v1 = vunpack.c.l.b16 %v547_v62  ;;  %857 = vmatmul.bf16.vlgmr.msrb.gmra.mxu3 %v797_v61  ;;  %v774_v11 = vrot.slane %v530_v5, 5  ;;  %v578_v12 = vshll.u32 %v530_v5, 16 }
 0x196   :  { %v600_v18 = vunpack.c.l.b16 %v557_v0  ;;  %v575_v19 = vor.u32 %v574_v7, %v570_v3  ;;  %v566_v36 = vrot.slane %v565_v9, 4  ;;  %v772_v16 = vsel %vm1605_vm1, %v1162_v10, %v771_v63 }
 0x197   :  { %v775_v13 = vsel %vm1605_vm1, %v773_v8, %v774_v11  ;;  %v580_v20 = vrot.slane %v578_v12, 5  ;;  %v795_v21 = vunpack.c.l.b16 %v772_v16 }
 0x198   :  { %v603_v31 = vpack.c.b16 %v600_v18, %v599_v1  ;;  %v576_v15 = vrot.slane %v575_v19, 4  ;;  %v796_v17 = vunpack.c.l.b16 %v775_v13  ;;  %v571_v37 = vsel %vm1617_vm2, %v566_v36, %v570_v3  ;;  %v952_v36 = vld [vmem:[%s1656_s5] sm:$0x1]  ;;  %s1388_s5 = smov [#allocation11]  }
 0x199   :  { %v601_v27 = vunpack.c.l.b16 %v571_v37  ;;  %s994_s9 = sshll.u32 %s1388_s5, 4  ;;  %s995_s9 = int_to_ptr.vmem [resolvable:$true] %s994_s9 }
 0x19a   :  { %663 = vmatmul.bf16.vlgmr.msrb.gmra.mxu1 %v603_v31  ;;  %v581_v26 = vsel %vm1617_vm2, %v576_v15, %v580_v20  ;;  %v798_v38 = vpack.c.b16 %v796_v17, %v795_v21  ;;  %v965_v17 = vld [vmem:[%s1657_s6] sm:$0x1]  ;;  %s996_s6 = sshll.u32 %s1659_s8, 4  ;;  %s997_s6 = int_to_ptr.hbm [resolvable:$true] %s996_s6 }
 0x19b   :  { %v602_v22 = vunpack.c.l.b16 %v581_v26 }
 0x19d   :  { %747 = vmatmul.bf16.gmra.mxu2 %v1214_v32  ;;  %v604_v34 = vpack.c.b16 %v602_v22, %v601_v27 }
 0x1a5   :  { %862 = vmatmul.bf16.gmra.mxu3 %v798_v38 }
 0x1aa   :  { %668 = vmatmul.bf16.gmra.mxu1 %v604_v34 }
 0x210   :  { %v743_v35 = vpop.f32.mrf.mxu2 }
 0x217   :  { %v664_v23 = vpop.f32.mrf.mxu1 }
 0x218   :  { %v858_v39 = vpop.f32.mrf.mxu3  ;;  %v745_v33 = vpop.f32.mrf.mxu2  ;;  %v744_v14 = vadd.f32 %v743_v35, %v664_v23 }
 0x21a   :  { %v868_v47 = vadd.f32 %v858_v39, %v744_v14 }
 0x21c   :  { %v881_v53 = vmul.f32 %v868_v47, %v868_v47 }
 0x21f   :  { %v666_v40 = vpop.f32.mrf.mxu1 }
 0x220   :  { %v860_v41 = vpop.f32.mrf.mxu3  ;;  %v748_v42 = vpop.f32.mrf.mxu2  ;;  %v746_v43 = vadd.f32 %v745_v33, %v666_v40 }
 0x222   :  { %v869_v45 = vadd.f32 %v860_v41, %v746_v43 }
 0x224   :  { %v882_v50 = vmul.f32 %v869_v45, %v869_v45  ;;  %v872_v46 = vadd.f32 %v869_v45, %v868_v47 }
 0x226   :  { %v885_v54 = vadd.f32 %v882_v50, %v881_v53 }
 0x227   :  { %v669_v24 = vpop.f32.mrf.mxu1 }
 0x228   :  { %v749_v44 = vadd.f32 %v748_v42, %v669_v24  ;;  %v863_v25 = vpop.f32.mrf.mxu3  ;;  %v750_v51 = vpop.f32.mrf.mxu2 }
 0x22a   :  { %v870_v49 = vadd.f32 %v863_v25, %v749_v44 }
 0x22c   :  { %v883_v28 = vmul.f32 %v870_v49, %v870_v49  ;;  %v873_v55 = vadd.f32 %v872_v46, %v870_v49 }
 0x22e   :  { %v886_v29 = vadd.f32 %v885_v54, %v883_v28 }
 0x22f   :  { %v671_v52 = vpop.f32.mrf.mxu1 }
 0x230   :  { %v751_v48 = vadd.f32 %v750_v51, %v671_v52  ;;  %v865_v59 = vpop.f32.mrf.mxu3 }
 0x232   :  { %v871_v56 = vadd.f32 %v865_v59, %v751_v48 }
 0x234   :  { %v874_v57 = vadd.f32 %v873_v55, %v871_v56  ;;  %v884_v58 = vmul.f32 %v871_v56, %v871_v56 }
 0x236   :  { %v875_v60 = vrot.slane %v874_v57, 4  ;;  %v887_v61 = vadd.f32 %v886_v29, %v884_v58 }
 0x238   :  { %v876_v62 = vadd.f32 %v875_v60, %v874_v57  ;;  %v888_v63 = vrot.slane %v887_v61, 4 }
 0x23a   :  { %v877_v0 = vrot.slane %v876_v62, 2  ;;  %v889_v1 = vadd.f32 %v888_v63, %v887_v61 }
 0x23c   :  { %v878_v2 = vadd.f32 %v877_v0, %v876_v62  ;;  %v890_v30 = vrot.slane %v889_v1, 2 }
 0x23e   :  { %v879_v18 = vrot.slane %v878_v2, 1  ;;  %v891_v3 = vadd.f32 %v890_v30, %v889_v1 }
 0x240   :  { %v880_v4 = vadd.f32 %v879_v18, %v878_v2  ;;  %v892_v31 = vrot.slane %v891_v3, 1 }
 0x242   :  { %926 = vmatmul.f32.vlgmr.msra.gmra.mxu0 %v880_v4  ;;  %v893_v5 = vadd.f32 %v892_v31, %v891_v3 }
 0x244   :  { %946 = vmatmul.f32.vlgmr.msra.gmra.mxu1 %v893_v5 }
 0x2bf   :  { %v927_v6 = vpop.f32.mrf.mxu0 }
 0x2c0   :  { %v950_v7 = vmul.f32 %v927_v6, %v927_v6 }
 0x2c1   :  { %v947_v8 = vpop.f32.mrf.mxu1 }
 0x2c2   :  { %v951_v9 = vsub.f32 %v947_v8, %v950_v7 }
 0x2c4   :  { %v953_v19 = vadd.f32 1e-05, %v951_v9 }
 0x2c6   :  { %1250 = vrsqrt.f32 %v953_v19  ;;  %vm960_vm4 = vweird.f32 %v953_v19 }
 0x2cc   :  { %v1251_v10 = vpop.eup %1250 }
 0x2cd   :  { %v955_v11 = vmul.f32 %v1251_v10, %v953_v19  ;;  %vm961_vm3 = vweird.f32 %v1251_v10 }
 0x2ce   :  { %vm962_vm5 = vmor %vm960_vm4, %vm961_vm3 }
 0x2cf   :  { %v956_v12 = vmul.f32 %v1251_v10, %v955_v11 }
 0x2d1   :  { %v957_v32 = vmul.f32 0.5, %v956_v12 }
 0x2d3   :  { %v958_v13 = vsub.f32 1.5, %v957_v32 }
 0x2d5   :  { %v959_v15 = vmul.f32 %v1251_v10, %v958_v13 }
 0x2d7   :  { %v963_v16 = vsel %vm962_vm5, %v1251_v10, %v959_v15 }
 0x2d8   :  { %v964_v20 = vmul.f32 %v963_v16, %v952_v36 }
 0x2da   :  { %v966_v37 = vmul.f32 %v964_v20, %v927_v6  ;;  %v969_v26 = vperm.slane %v964_v20, 0 }
 0x2dc   :  { %v967_v21 = vsub.f32 %v965_v17, %v966_v37  ;;  %v971_v38 = vmul.f32 %v969_v26, %v868_v47  ;;  %v972_v22 = vmul.f32 %v969_v26, %v869_v45  ;;  %v973_v34 = vmul.f32 %v969_v26, %v870_v49 }
 0x2dd   :  { %v974_v35 = vmul.f32 %v969_v26, %v871_v56 }
 0x2de   :  { %v976_v27 = vperm.slane %v967_v21, 0 }
 0x2e0   :  { %v978_v23 = vadd.f32 %v976_v27, %v971_v38  ;;  %v979_v39 = vadd.f32 %v976_v27, %v972_v22  ;;  %v980_v33 = vadd.f32 %v976_v27, %v973_v34  ;;  %v981_v40 = vadd.f32 %v976_v27, %v974_v35 }
 0x2e2   :  { %v982_v41 = vmax.f32 %v978_v23, 0.0  ;;  %v983_v42 = vmax.f32 %v979_v39, 0.0  ;;  %v984_v43 = vmax.f32 %v980_v33, 0.0  ;;  %v985_v24 = vmax.f32 %v981_v40, 0.0 }
 0x2e4   :  { %986 = vst [vmem:[#allocation11] sm:$0xff] %v982_v41 }
 0x2e5   :  { %987 = vst [vmem:[#allocation11 + $0x8] sm:$0xff] %v983_v42 }
 0x2e6   :  { %988 = vst [vmem:[#allocation11 + $0x10] sm:$0xff] %v984_v43 }
 0x2e7   :  { %989 = vst [vmem:[#allocation11 + $0x18] sm:$0xff] %v985_v24 }
 0x2e8   :  { %1002 = dma.vmem_to_hbm [thread:$0]  %s995_s9, 512, %s997_s6, [#allocation5], %s1386_s25, %s1386_s25, %s1387_s26  }
 0x2e9   :  { %1378 = dma.done.wait [#allocation5], 512  }
 0x2ea   :  { %1379 = vsyncadd [#allocation5], 4294966784 }
 0x2eb   :  { %1007 = vsyncpa [#allocation4], 1 }
 0x2ec   :  { %1008 = vsyncpa [#allocation7], 1 }
 0x2ed   :  { %1009 = vsyncpa [#allocation10], 1 }
 0x2ee   :  { %1010 = vsyncpa [#allocation5], 1 }

</bundles_post_ra>
